<compile_context>
chip_gen: v7x
topology: tpu7x:2x2x1
jax: 0.10.0
libtpu: 0.0.40
codegen_flags: <defaults>
</compile_context>

<pallas_src>
import functools

import jax
import jax.numpy as jnp
from jax.experimental import pallas as pl
from jax.experimental.pallas import tpu as pltpu

_BN_EPS = 1e-5


def _resblock_kernel(x_ref, w1_ref, s1_ref, b1_ref, w2_ref, s2_ref, b2_ref,
                     ml_ref, mr_ref, o_ref, *, C, Hp, Wp, res_scale):
    """Fused ResidualBlock for one batch element.

    Image tensors are (C, Hp*Wp): channels on sublanes, flattened *padded*
    spatial on lanes.  Border positions of the padded grid carry garbage that
    is rebuilt by the reflection fix-up (intermediate) or discarded by the
    caller (final output).
    """
    HW = Hp * Wp
    x = x_ref[0].astype(jnp.float32)           # (C, HW), reflection-padded
    m_l = ml_ref[...]                          # (1, HW) 1.0 at padded col 0
    m_r = mr_ref[...]                          # (1, HW) 1.0 at padded col Wp-1

    def conv3x3(img, w_ref):
        # im2col on the padded grid: every tap is a constant lane shift of the
        # flattened image.  A zero extension absorbs the (garbage) border taps.
        zpad = jnp.zeros((C, Wp + 1), jnp.float32)
        ext = jnp.concatenate([zpad, img, zpad], axis=1)      # (C, HW+2Wp+2)
        slabs = [ext[:, ky * Wp + kx: ky * Wp + kx + HW]
                 for ky in range(3) for kx in range(3)]
        xcol = jnp.concatenate(slabs, axis=0)                 # (9C, HW)
        w = w_ref[...].astype(jnp.float32)                    # (C, 9C)
        # single MXU matmul per conv, f32 accumulate
        return jnp.dot(w, xcol, preferred_element_type=jnp.float32)

    def reflect_repad(h):
        # Rebuild reflection padding of the VMEM-resident intermediate on the
        # padded grid: row 0 := row 2, row Hp-1 := row Hp-3, then
        # col 0 := col 2, col Wp-1 := col Wp-3.
        top = h[:, 2 * Wp:3 * Wp]
        mid = h[:, Wp:(Hp - 1) * Wp]
        bot = h[:, (Hp - 3) * Wp:(Hp - 2) * Wp]
        h = jnp.concatenate([top, mid, bot], axis=1)          # rows fixed
        z2 = jnp.zeros((C, 2), jnp.float32)
        plus2 = jnp.concatenate([h[:, 2:], z2], axis=1)       # value at lane+2
        minus2 = jnp.concatenate([z2, h[:, :-2]], axis=1)     # value at lane-2
        h = jnp.where(m_l > 0.5, plus2, h)                    # left column
        h = jnp.where(m_r > 0.5, minus2, h)                   # right column
        return h

    # conv1 -> folded (bias + BatchNorm) -> ReLU
    h = conv3x3(x, w1_ref) * s1_ref[...] + b1_ref[...]
    h = jnp.maximum(h, 0.0)
    # in-kernel reflection re-pad, then conv2 -> folded (bias + BatchNorm)
    out = conv3x3(reflect_repad(h), w2_ref) * s2_ref[...] + b2_ref[...]
    # scaled residual add: x is the padded input, interior positions line up
    out = out * res_scale + x
    o_ref[0] = out.astype(o_ref.dtype)


def _fold_bn(conv_bias, gamma, beta, mean, var):
    scale = gamma / jnp.sqrt(var + _BN_EPS)
    bias = (conv_bias - mean) * scale + beta
    return scale, bias


@functools.partial(jax.jit, static_argnames=("res_scale",))
def residual_block_forward(x_nchw, p, *, res_scale=1.0):
    """Pallas implementation of ResidualBlock.forward (NCHW in, NCHW out)."""
    N, C, H, W = x_nchw.shape
    Hp, Wp = H + 2, W + 2
    HW = Hp * Wp

    # One reflection pad of the input (XLA side), then only free reshapes;
    # the second pad happens inside the kernel.  No layout transposes.
    x_pad = jnp.pad(x_nchw, ((0, 0), (0, 0), (1, 1), (1, 1)), mode="reflect")
    x_flat = x_pad.reshape(N, C, HW)

    # Fold conv bias + BatchNorm running stats into per-channel scale / bias.
    s1, b1 = _fold_bn(p["b1"], p["g1"], p["be1"], p["m1"], p["v1"])
    s2, b2 = _fold_bn(p["b2"], p["g2"], p["be2"], p["m2"], p["v2"])

    # HWIO (3,3,Cin,Cout) -> (Cout, 9*Cin), column order = (tap, c_in),
    # matching the kernel's im2col row order.
    w1 = p["w1"].reshape(9 * C, C).T
    w2 = p["w2"].reshape(9 * C, C).T

    # Masks marking the left / right padded column of the flattened grid.
    col = jnp.arange(HW, dtype=jnp.int32) % Wp
    m_l = (col == 0).astype(jnp.float32)[None, :]
    m_r = (col == Wp - 1).astype(jnp.float32)[None, :]

    kernel = functools.partial(_resblock_kernel, C=C, Hp=Hp, Wp=Wp,
                               res_scale=float(res_scale))

    out_flat = pl.pallas_call(
        kernel,
        out_shape=jax.ShapeDtypeStruct((N, C, HW), x_nchw.dtype),
        grid_spec=pltpu.PrefetchScalarGridSpec(
            num_scalar_prefetch=0,
            grid=(N,),
            in_specs=[
                pl.BlockSpec((1, C, HW), lambda n: (n, 0, 0)),   # x (padded)
                pl.BlockSpec((C, 9 * C), lambda n: (0, 0)),      # w1
                pl.BlockSpec((C, 1), lambda n: (0, 0)),          # scale1
                pl.BlockSpec((C, 1), lambda n: (0, 0)),          # bias1
                pl.BlockSpec((C, 9 * C), lambda n: (0, 0)),      # w2
                pl.BlockSpec((C, 1), lambda n: (0, 0)),          # scale2
                pl.BlockSpec((C, 1), lambda n: (0, 0)),          # bias2
                pl.BlockSpec((1, HW), lambda n: (0, 0)),         # left mask
                pl.BlockSpec((1, HW), lambda n: (0, 0)),         # right mask
            ],
            out_specs=pl.BlockSpec((1, C, HW), lambda n: (n, 0, 0)),
        ),
        compiler_params=pltpu.CompilerParams(
            dimension_semantics=("parallel",)),
    )(x_flat, w1, s1.reshape(C, 1), b1.reshape(C, 1),
      w2, s2.reshape(C, 1), b2.reshape(C, 1), m_l, m_r)

    # Drop the padded border and restore NCHW.
    return out_flat.reshape(N, C, Hp, Wp)[:, :, 1:H + 1, 1:W + 1]


# ---------------------------- pure-JAX reference ----------------------------

def _ref_conv(x_pad_nchw, w_hwio):
    return jax.lax.conv_general_dilated(
        x_pad_nchw, w_hwio, window_strides=(1, 1), padding="VALID",
        dimension_numbers=("NCHW", "HWIO", "NCHW"),
        precision=jax.lax.Precision.HIGHEST)


def residual_block_reference(x, p, *, res_scale=1.0):
    pad = lambda z: jnp.pad(z, ((0, 0), (0, 0), (1, 1), (1, 1)), mode="reflect")

    def bn(z, b, g, be, m, v):
        inv = (g / jnp.sqrt(v + _BN_EPS))[None, :, None, None]
        return ((z + b[None, :, None, None] - m[None, :, None, None]) * inv
                + be[None, :, None, None])

    h = bn(_ref_conv(pad(x), p["w1"]),
           p["b1"], p["g1"], p["be1"], p["m1"], p["v1"])
    h = jnp.maximum(h, 0.0)
    o = bn(_ref_conv(pad(h), p["w2"]),
           p["b2"], p["g2"], p["be2"], p["m2"], p["v2"])
    return o * res_scale + x


# --------------------------------- params -----------------------------------

def init_params(key, channels):
    C = channels
    k = jax.random.split(key, 12)
    p = {}
    p["w1"] = 0.1 * jax.random.normal(k[0], (3, 3, C, C), jnp.float32)
    p["b1"] = 0.05 * jax.random.normal(k[1], (C,), jnp.float32)
    p["g1"] = 1.0 + 0.1 * jax.random.normal(k[2], (C,), jnp.float32)
    p["be1"] = 0.05 * jax.random.normal(k[3], (C,), jnp.float32)
    p["m1"] = 0.05 * jax.random.normal(k[4], (C,), jnp.float32)
    p["v1"] = 1.0 + 0.1 * jax.random.uniform(k[5], (C,), jnp.float32)
    p["w2"] = 0.1 * jax.random.normal(k[6], (3, 3, C, C), jnp.float32)
    p["b2"] = 0.05 * jax.random.normal(k[7], (C,), jnp.float32)
    p["g2"] = 1.0 + 0.1 * jax.random.normal(k[8], (C,), jnp.float32)
    p["be2"] = 0.05 * jax.random.normal(k[9], (C,), jnp.float32)
    p["m2"] = 0.05 * jax.random.normal(k[10], (C,), jnp.float32)
    p["v2"] = 1.0 + 0.1 * jax.random.uniform(k[11], (C,), jnp.float32)
    return p


if __name__ == "__main__":
    key = jax.random.PRNGKey(0)
    k_x, k_p = jax.random.split(key)

    N, C, H, W = 2, 8, 16, 16            # PyTorch-convention NCHW input
    x = jax.random.normal(k_x, (N, C, H, W), jnp.float32)
    params = init_params(k_p, C)

    out = jax.block_until_ready(
        residual_block_forward(x, params, res_scale=1.0))
    ref = jax.block_until_ready(
        residual_block_reference(x, params, res_scale=1.0))

    assert out.shape == x.shape and out.dtype == x.dtype
    if not jnp.allclose(out, ref, atol=2e-3, rtol=2e-3):
        max_err = float(jnp.max(jnp.abs(out - ref)))
        raise AssertionError(f"Pallas output mismatch, max_err={max_err}")

    print("KERNEL_OK")
</pallas_src>

<mosaic_0001>
module attributes {stable_mosaic.version = 11 : i64} {
  func.func @_resblock_kernel(%arg0: i32, %arg1: memref<1x8x324xf32, #tpu.memory_space<vmem>>, %arg2: memref<8x72xf32, #tpu.memory_space<vmem>>, %arg3: memref<8x1xf32, #tpu.memory_space<vmem>>, %arg4: memref<8x1xf32, #tpu.memory_space<vmem>>, %arg5: memref<8x72xf32, #tpu.memory_space<vmem>>, %arg6: memref<8x1xf32, #tpu.memory_space<vmem>>, %arg7: memref<8x1xf32, #tpu.memory_space<vmem>>, %arg8: memref<1x324xf32, #tpu.memory_space<vmem>>, %arg9: memref<1x324xf32, #tpu.memory_space<vmem>>, %arg10: memref<1x8x324xf32, #tpu.memory_space<vmem>>) attributes {dimension_semantics = [#tpu.dimension_semantics<parallel>], iteration_bounds = array<i64: 2>, scalar_prefetch = 0 : i64, scratch_operands = 0 : i64, tpu.core_type = #tpu.core_type<tc>, window_params = [{transform_indices = @transform_0, window_bounds = array<i64: 1, 8, 324>}, {pipeline_mode = #tpu.pipeline_mode<synchronous>, transform_indices = @transform_1, window_bounds = array<i64: 8, 72>}, {pipeline_mode = #tpu.pipeline_mode<synchronous>, transform_indices = @transform_2, window_bounds = array<i64: 8, 1>}, {pipeline_mode = #tpu.pipeline_mode<synchronous>, transform_indices = @transform_3, window_bounds = array<i64: 8, 1>}, {pipeline_mode = #tpu.pipeline_mode<synchronous>, transform_indices = @transform_4, window_bounds = array<i64: 8, 72>}, {pipeline_mode = #tpu.pipeline_mode<synchronous>, transform_indices = @transform_5, window_bounds = array<i64: 8, 1>}, {pipeline_mode = #tpu.pipeline_mode<synchronous>, transform_indices = @transform_6, window_bounds = array<i64: 8, 1>}, {pipeline_mode = #tpu.pipeline_mode<synchronous>, transform_indices = @transform_7, window_bounds = array<i64: 1, 324>}, {pipeline_mode = #tpu.pipeline_mode<synchronous>, transform_indices = @transform_8, window_bounds = array<i64: 1, 324>}, {transform_indices = @transform_9, window_bounds = array<i64: 1, 8, 324>}]} {
    %c0 = arith.constant 0 : index
    %c0_0 = arith.constant 0 : index
    %c0_1 = arith.constant 0 : index
    %0 = vector.load %arg1[%c0, %c0_0, %c0_1] : memref<1x8x324xf32, #tpu.memory_space<vmem>>, vector<1x8x324xf32>
    %1 = vector.shape_cast %0 : vector<1x8x324xf32> to vector<8x324xf32>
    %c0_2 = arith.constant 0 : index
    %c0_3 = arith.constant 0 : index
    %2 = vector.load %arg8[%c0_2, %c0_3] : memref<1x324xf32, #tpu.memory_space<vmem>>, vector<1x324xf32>
    %c0_4 = arith.constant 0 : index
    %c0_5 = arith.constant 0 : index
    %3 = vector.load %arg9[%c0_4, %c0_5] : memref<1x324xf32, #tpu.memory_space<vmem>>, vector<1x324xf32>
    %cst = arith.constant 0.000000e+00 : f32
    %4 = vector.broadcast %cst : f32 to vector<8x19xf32>
    %5 = tpu.concatenate %4, %1, %4 in 1 : vector<8x19xf32>, vector<8x324xf32>, vector<8x19xf32> -> vector<8x362xf32>
    %6 = vector.extract_strided_slice %5 {offsets = [0, 0], sizes = [8, 324], strides = [1, 1]} : vector<8x362xf32> to vector<8x324xf32>
    %7 = vector.extract_strided_slice %5 {offsets = [0, 1], sizes = [8, 324], strides = [1, 1]} : vector<8x362xf32> to vector<8x324xf32>
    %8 = vector.extract_strided_slice %5 {offsets = [0, 2], sizes = [8, 324], strides = [1, 1]} : vector<8x362xf32> to vector<8x324xf32>
    %9 = vector.extract_strided_slice %5 {offsets = [0, 18], sizes = [8, 324], strides = [1, 1]} : vector<8x362xf32> to vector<8x324xf32>
    %10 = vector.extract_strided_slice %5 {offsets = [0, 19], sizes = [8, 324], strides = [1, 1]} : vector<8x362xf32> to vector<8x324xf32>
    %11 = vector.extract_strided_slice %5 {offsets = [0, 20], sizes = [8, 324], strides = [1, 1]} : vector<8x362xf32> to vector<8x324xf32>
    %12 = vector.extract_strided_slice %5 {offsets = [0, 36], sizes = [8, 324], strides = [1, 1]} : vector<8x362xf32> to vector<8x324xf32>
    %13 = vector.extract_strided_slice %5 {offsets = [0, 37], sizes = [8, 324], strides = [1, 1]} : vector<8x362xf32> to vector<8x324xf32>
    %14 = vector.extract_strided_slice %5 {offsets = [0, 38], sizes = [8, 324], strides = [1, 1]} : vector<8x362xf32> to vector<8x324xf32>
    %15 = tpu.concatenate %6, %7, %8, %9, %10, %11, %12, %13, %14 in 0 : vector<8x324xf32>, vector<8x324xf32>, vector<8x324xf32>, vector<8x324xf32>, vector<8x324xf32>, vector<8x324xf32>, vector<8x324xf32>, vector<8x324xf32>, vector<8x324xf32> -> vector<72x324xf32>
    %c0_6 = arith.constant 0 : index
    %c0_7 = arith.constant 0 : index
    %16 = vector.load %arg2[%c0_6, %c0_7] : memref<8x72xf32, #tpu.memory_space<vmem>>, vector<8x72xf32>
    %cst_8 = arith.constant dense<0.000000e+00> : vector<8x324xf32>
    %17 = tpu.matmul %16, %15, %cst_8 {dimension_numbers = #tpu.dot_dimension_numbers<[1], [0], [0], [1], [0, 0, 1, 1], [], []>} : vector<8x72xf32>, vector<72x324xf32>, vector<8x324xf32> -> vector<8x324xf32>
    %c0_9 = arith.constant 0 : index
    %c0_10 = arith.constant 0 : index
    %18 = vector.load %arg3[%c0_9, %c0_10] : memref<8x1xf32, #tpu.memory_space<vmem>>, vector<8x1xf32>
    %19 = vector.broadcast %18 : vector<8x1xf32> to vector<8x324xf32>
    %20 = arith.mulf %17, %19 : vector<8x324xf32>
    %c0_11 = arith.constant 0 : index
    %c0_12 = arith.constant 0 : index
    %21 = vector.load %arg4[%c0_11, %c0_12] : memref<8x1xf32, #tpu.memory_space<vmem>>, vector<8x1xf32>
    %22 = vector.broadcast %21 : vector<8x1xf32> to vector<8x324xf32>
    %23 = arith.addf %20, %22 : vector<8x324xf32>
    %cst_13 = arith.constant 0.000000e+00 : f32
    %24 = vector.broadcast %cst_13 : f32 to vector<8x324xf32>
    %25 = arith.maximumf %23, %24 : vector<8x324xf32>
    %26 = vector.extract_strided_slice %25 {offsets = [0, 36], sizes = [8, 18], strides = [1, 1]} : vector<8x324xf32> to vector<8x18xf32>
    %27 = vector.extract_strided_slice %25 {offsets = [0, 18], sizes = [8, 288], strides = [1, 1]} : vector<8x324xf32> to vector<8x288xf32>
    %28 = vector.extract_strided_slice %25 {offsets = [0, 270], sizes = [8, 18], strides = [1, 1]} : vector<8x324xf32> to vector<8x18xf32>
    %29 = tpu.concatenate %26, %27, %28 in 1 : vector<8x18xf32>, vector<8x288xf32>, vector<8x18xf32> -> vector<8x324xf32>
    %cst_14 = arith.constant 0.000000e+00 : f32
    %30 = vector.broadcast %cst_14 : f32 to vector<8x2xf32>
    %31 = vector.extract_strided_slice %29 {offsets = [0, 2], sizes = [8, 322], strides = [1, 1]} : vector<8x324xf32> to vector<8x322xf32>
    %32 = tpu.concatenate %31, %30 in 1 : vector<8x322xf32>, vector<8x2xf32> -> vector<8x324xf32>
    %33 = vector.extract_strided_slice %29 {offsets = [0, 0], sizes = [8, 322], strides = [1, 1]} : vector<8x324xf32> to vector<8x322xf32>
    %34 = tpu.concatenate %30, %33 in 1 : vector<8x2xf32>, vector<8x322xf32> -> vector<8x324xf32>
    %cst_15 = arith.constant 5.000000e-01 : f32
    %35 = vector.broadcast %cst_15 : f32 to vector<1x324xf32>
    %36 = arith.cmpf ogt, %2, %35 : vector<1x324xf32>
    %37 = vector.shape_cast %36 : vector<1x324xi1> to vector<1x324xi1>
    %38 = vector.broadcast %37 : vector<1x324xi1> to vector<8x324xi1>
    %39 = arith.select %38, %32, %29 : vector<8x324xi1>, vector<8x324xf32>
    %cst_16 = arith.constant 5.000000e-01 : f32
    %40 = vector.broadcast %cst_16 : f32 to vector<1x324xf32>
    %41 = arith.cmpf ogt, %3, %40 : vector<1x324xf32>
    %42 = vector.shape_cast %41 : vector<1x324xi1> to vector<1x324xi1>
    %43 = vector.broadcast %42 : vector<1x324xi1> to vector<8x324xi1>
    %44 = arith.select %43, %34, %39 : vector<8x324xi1>, vector<8x324xf32>
    %cst_17 = arith.constant 0.000000e+00 : f32
    %45 = vector.broadcast %cst_17 : f32 to vector<8x19xf32>
    %46 = tpu.concatenate %45, %44, %45 in 1 : vector<8x19xf32>, vector<8x324xf32>, vector<8x19xf32> -> vector<8x362xf32>
    %47 = vector.extract_strided_slice %46 {offsets = [0, 0], sizes = [8, 324], strides = [1, 1]} : vector<8x362xf32> to vector<8x324xf32>
    %48 = vector.extract_strided_slice %46 {offsets = [0, 1], sizes = [8, 324], strides = [1, 1]} : vector<8x362xf32> to vector<8x324xf32>
    %49 = vector.extract_strided_slice %46 {offsets = [0, 2], sizes = [8, 324], strides = [1, 1]} : vector<8x362xf32> to vector<8x324xf32>
    %50 = vector.extract_strided_slice %46 {offsets = [0, 18], sizes = [8, 324], strides = [1, 1]} : vector<8x362xf32> to vector<8x324xf32>
    %51 = vector.extract_strided_slice %46 {offsets = [0, 19], sizes = [8, 324], strides = [1, 1]} : vector<8x362xf32> to vector<8x324xf32>
    %52 = vector.extract_strided_slice %46 {offsets = [0, 20], sizes = [8, 324], strides = [1, 1]} : vector<8x362xf32> to vector<8x324xf32>
    %53 = vector.extract_strided_slice %46 {offsets = [0, 36], sizes = [8, 324], strides = [1, 1]} : vector<8x362xf32> to vector<8x324xf32>
    %54 = vector.extract_strided_slice %46 {offsets = [0, 37], sizes = [8, 324], strides = [1, 1]} : vector<8x362xf32> to vector<8x324xf32>
    %55 = vector.extract_strided_slice %46 {offsets = [0, 38], sizes = [8, 324], strides = [1, 1]} : vector<8x362xf32> to vector<8x324xf32>
    %56 = tpu.concatenate %47, %48, %49, %50, %51, %52, %53, %54, %55 in 0 : vector<8x324xf32>, vector<8x324xf32>, vector<8x324xf32>, vector<8x324xf32>, vector<8x324xf32>, vector<8x324xf32>, vector<8x324xf32>, vector<8x324xf32>, vector<8x324xf32> -> vector<72x324xf32>
    %c0_18 = arith.constant 0 : index
    %c0_19 = arith.constant 0 : index
    %57 = vector.load %arg5[%c0_18, %c0_19] : memref<8x72xf32, #tpu.memory_space<vmem>>, vector<8x72xf32>
    %cst_20 = arith.constant dense<0.000000e+00> : vector<8x324xf32>
    %58 = tpu.matmul %57, %56, %cst_20 {dimension_numbers = #tpu.dot_dimension_numbers<[1], [0], [0], [1], [0, 0, 1, 1], [], []>} : vector<8x72xf32>, vector<72x324xf32>, vector<8x324xf32> -> vector<8x324xf32>
    %c0_21 = arith.constant 0 : index
    %c0_22 = arith.constant 0 : index
    %59 = vector.load %arg6[%c0_21, %c0_22] : memref<8x1xf32, #tpu.memory_space<vmem>>, vector<8x1xf32>
    %60 = vector.broadcast %59 : vector<8x1xf32> to vector<8x324xf32>
    %61 = arith.mulf %58, %60 : vector<8x324xf32>
    %c0_23 = arith.constant 0 : index
    %c0_24 = arith.constant 0 : index
    %62 = vector.load %arg7[%c0_23, %c0_24] : memref<8x1xf32, #tpu.memory_space<vmem>>, vector<8x1xf32>
    %63 = vector.broadcast %62 : vector<8x1xf32> to vector<8x324xf32>
    %64 = arith.addf %61, %63 : vector<8x324xf32>
    %cst_25 = arith.constant 1.000000e+00 : f32
    %65 = vector.broadcast %cst_25 : f32 to vector<8x324xf32>
    %66 = arith.mulf %64, %65 : vector<8x324xf32>
    %67 = arith.addf %66, %1 : vector<8x324xf32>
    %c0_26 = arith.constant 0 : index
    %c0_27 = arith.constant 0 : index
    %c0_28 = arith.constant 0 : index
    %68 = vector.load %arg10[%c0_26, %c0_27, %c0_28] : memref<1x8x324xf32, #tpu.memory_space<vmem>>, vector<1x8x324xf32>
    %69 = vector.shape_cast %68 : vector<1x8x324xf32> to vector<8x324xf32>
    %70 = vector.shape_cast %67 : vector<8x324xf32> to vector<1x8x324xf32>
    tpu.vector_store %arg10[%c0_26, %c0_27, %c0_28], %70 {strides = array<i32>} : memref<1x8x324xf32, #tpu.memory_space<vmem>>, vector<1x8x324xf32>,
    return
  }
  func.func @transform_0(%arg0: i32) -> (i32, i32, i32) {
    %c0_i32 = arith.constant 0 : i32
    %c0_i32_0 = arith.constant 0 : i32
    %c0_i32_1 = arith.constant 0 : i32
    return %arg0, %c0_i32, %c0_i32_0 : i32, i32, i32
  }
  func.func @transform_1(%arg0: i32) -> (i32, i32) {
    %c0_i32 = arith.constant 0 : i32
    %c0_i32_0 = arith.constant 0 : i32
    %c0_i32_1 = arith.constant 0 : i32
    return %c0_i32, %c0_i32_0 : i32, i32
  }
  func.func @transform_2(%arg0: i32) -> (i32, i32) {
    %c0_i32 = arith.constant 0 : i32
    %c0_i32_0 = arith.constant 0 : i32
    %c0_i32_1 = arith.constant 0 : i32
    return %c0_i32, %c0_i32_0 : i32, i32
  }
  func.func @transform_3(%arg0: i32) -> (i32, i32) {
    %c0_i32 = arith.constant 0 : i32
    %c0_i32_0 = arith.constant 0 : i32
    %c0_i32_1 = arith.constant 0 : i32
    return %c0_i32, %c0_i32_0 : i32, i32
  }
  func.func @transform_4(%arg0: i32) -> (i32, i32) {
    %c0_i32 = arith.constant 0 : i32
    %c0_i32_0 = arith.constant 0 : i32
    %c0_i32_1 = arith.constant 0 : i32
    return %c0_i32, %c0_i32_0 : i32, i32
  }
  func.func @transform_5(%arg0: i32) -> (i32, i32) {
    %c0_i32 = arith.constant 0 : i32
    %c0_i32_0 = arith.constant 0 : i32
    %c0_i32_1 = arith.constant 0 : i32
    return %c0_i32, %c0_i32_0 : i32, i32
  }
  func.func @transform_6(%arg0: i32) -> (i32, i32) {
    %c0_i32 = arith.constant 0 : i32
    %c0_i32_0 = arith.constant 0 : i32
    %c0_i32_1 = arith.constant 0 : i32
    return %c0_i32, %c0_i32_0 : i32, i32
  }
  func.func @transform_7(%arg0: i32) -> (i32, i32) {
    %c0_i32 = arith.constant 0 : i32
    %c0_i32_0 = arith.constant 0 : i32
    %c0_i32_1 = arith.constant 0 : i32
    return %c0_i32, %c0_i32_0 : i32, i32
  }
  func.func @transform_8(%arg0: i32) -> (i32, i32) {
    %c0_i32 = arith.constant 0 : i32
    %c0_i32_0 = arith.constant 0 : i32
    %c0_i32_1 = arith.constant 0 : i32
    return %c0_i32, %c0_i32_0 : i32, i32
  }
  func.func @transform_9(%arg0: i32) -> (i32, i32, i32) {
    %c0_i32 = arith.constant 0 : i32
    %c0_i32_0 = arith.constant 0 : i32
    %c0_i32_1 = arith.constant 0 : i32
    return %arg0, %c0_i32, %c0_i32_0 : i32, i32, i32
  }
}

</mosaic_0001>

<bundles_post_ra>
// kernel: residual_block_forward.1
= control target key start
LH: loop header
LB: loop body
LE: loop exit
PB: predicated region body
PF: predicated region fallthrough
CT: control target
= control target key end

     0   :  { %s1345_s30 = smov 0   ;;  %s1541_s0 = inlined_call_operand.vmem [shape: f32[2,8,324], index: 0, kind: input, shape index: {}]   ;;  %s1542_s1 = inlined_call_operand.vmem [shape: f32[8,72], index: 1, kind: input, shape index: {}]   ;;  %s1543_s2 = inlined_call_operand.vmem [shape: f32[8,1], index: 2, kind: input, shape index: {}]   ;;  %s1544_s3 = inlined_call_operand.vmem [shape: f32[8,1], index: 3, kind: input, shape index: {}]   ;;  %s1545_s4 = inlined_call_operand.vmem [shape: f32[8,72], index: 4, kind: input, shape index: {}]   ;;  %s1546_s5 = inlined_call_operand.vmem [shape: f32[8,1], index: 5, kind: input, shape index: {}]   ;;  %s1547_s6 = inlined_call_operand.vmem [shape: f32[8,1], index: 6, kind: input, shape index: {}]   ;;  %s1548_s7 = inlined_call_operand.vmem [shape: f32[1,324], index: 7, kind: input, shape index: {}]   ;;  %s1549_s8 = inlined_call_operand.vmem [shape: f32[1,324], index: 8, kind: input, shape index: {}]   ;;  %s1550_s9 = inlined_call_operand.vmem [shape: f32[2,8,324], index: 9, kind: output, shape index: {}]  }
   0x1 LB: > { %s1033_s10 = sadd.s32 4294967295, %s1277_s30   ;;  %p1037_p0 = scmp.ge.s32.totalorder %s1277_s30, 1  ;;  %s1277_s30 = sphi %s1345_s30, %s19_s30  }
   0x2   : > { %p287_p1 = scmp.lt.s32.totalorder %s1277_s30, 3 }
   0x4   : > { %p288_p2 = pnand %p1037_p0, %p287_p1 }
   0x5   : > { %p323_p3 = scmp.lt.s32.totalorder (!%p288_p2), %s1033_s10, 1  ;;  %s1279_s15 = smov (!%p288_p2), 19   ;;  %vm347_vm0 = vcmask (!%p288_p2), 154624   ;;  %v1282_v7 = vmov (!%p288_p2), 0.0|0.0   ;;  %vm354_vm1 = vcmask (!%p288_p2), 711680   ;;  %v1287_v12 = vmov (!%p288_p2), 0.0  }
   0x6   : > { %291 = sbr.rel (%p288_p2) target bundleno = 1230 (0x4ce), region = 56  ;;  %s1280_s16 = smov (!%p288_p2), 126   ;;  %1131 = vmatprep.subr.bf16.mxu1 (!%p288_p2), %v1282_v7  ;;  %523 = vmatprep.mubr.f32.mxu0 (!%p288_p2), %v1287_v12  ;;  %vm1289_vm2 = vmmov (!%p288_p2), 0   ;;  %v1290_v13 = vmov (!%p288_p2), 0   ;;  %v600_v14 = vld [vmem:[%s1543_s2] sm:$0xff] (!%p288_p2)  ;;  %vm364_vm3 = vcmask (!%p288_p2), 1039360   ;;  %vm1040_vm4 = vmneg (!%p288_p2), %vm347_vm0 }
   0x7   : > { %s1281_s17 = smov (!%p288_p2), 127   ;;  %s1283_s18 = smov (!%p288_p2), 109   ;;  %1090 = vmatprep.mubr.msk.f32.mxu1 (!%p288_p2), %vm1289_vm2, %v1287_v12  ;;  %1234 = vset.pattern.permute.xlu0 (!%p288_p2), %v1290_v13  ;;  %v609_v15 = vld [vmem:[%s1544_s3] sm:$0xff] (!%p288_p2)  ;;  %vm1292_vm5 = vmmov (!%p288_p2), 1   ;;  %vm388_vm7 = vcmask (!%p288_p2), 900096   ;;  %vm376_vm9 = vcmask (!%p288_p2), 1031168  }
   0x8   : > { %s1284_s19 = smov (!%p288_p2), 110   ;;  %s1285_s20 = smov (!%p288_p2), 92   ;;  %1235 = vset.pattern.permute.xlu1 (!%p288_p2), %v1290_v13  ;;  %vm1414_vm6 = vmpackc.low (!%p288_p2), %vm1292_vm5, %vm354_vm1  ;;  %vm1555_vm10 = vcmask (!%p288_p2), 883712   ;;  %vm400_vm11 = vcmask (!%p288_p2), 891904   ;;  %vm1553_vm12 = vcmask (!%p288_p2), 744448   ;;  %vm1554_vm13 = vcmask (!%p288_p2), 752640  }
   0x9   : > { %s1286_s21 = smov (!%p288_p2), 108   ;;  %s1288_s22 = smov (!%p288_p2), 91   ;;  %vm1421_vm8 = vmpackc.low (!%p288_p2), %vm1292_vm5, %vm1040_vm4  ;;  %vm1552_vm14 = vcmask (!%p288_p2), 736256   ;;  %vm1551_vm15 = vcmask (!%p288_p2), 588800   ;;  %vm629_vm4 = vcmask (!%p288_p2), 146432  }
   0xa   : > { %s1291_s23 = smov (!%p288_p2), 90   ;;  %s1293_s12 = smov (!%p288_p2), 36  }
   0xb   : > { %s1294_s13 = smov (!%p288_p2), 2  }
   0xd   : > { %s1571_s10 = smov (!%p323_p3, %s1033_s10), 1 }
   0xe   : > { %s1174_s11 = smul.u32 24, %s1571_s10 }
  0x10   : > { %s327_s14 = scalar_lea.vmem %s1541_s0, %s1174_s11 }
  0x11   : > { %v1361_v0 = vld [vmem:[%s327_s14 + $0x8] sm:$0xff]  ;;  %v1363_v1 = vld [vmem:[%s327_s14] sm:$0xff]  ;;  %v1369_v2 = vld [vmem:[%s327_s14 + $0x10] sm:$0xff] }
  0x12   : > { %343 = vrot.lane.b32.xlu0 %v1361_v0, %s1279_s15  ;;  %341 = vrot.lane.b32.xlu1 %v1363_v1, %s1279_s15 }
  0x16   : > { %345 = vrot.lane.b32.xlu0 %v1369_v2, %s1279_s15 }
  0x84   : > { %v344_v3 = vpop.permute.xlu0 %343  ;;  %v1373_v4 = vpop.permute.xlu1 %341 }
  0x85   : > { %v353_v5 = vsel %vm347_vm0, 0.0, %v1373_v4  ;;  %v348_v10 = vsel %vm347_vm0, %v1373_v4, %v344_v3 }
  0x86   : > { %370 = vrot.lane.b32.xlu1 %v353_v5, %s1280_s16  ;;  %358 = vrot.lane.b32.xlu0 %v353_v5, %s1281_s17 }
  0x88   : > { %v346_v6 = vpop.permute.xlu0 %345 }
  0x89   : > { %v349_v8 = vsel %vm347_vm0, %v344_v3, %v346_v6 }
  0x8a   : > { %394 = vrot.lane.b32.xlu1 %v353_v5, %s1283_s18  ;;  %382 = vrot.lane.b32.xlu0 %v353_v5, %s1284_s19  ;;  %v355_v9 = vsel %vm354_vm1, %v349_v8, 0.0 }
  0x8b   : > { %v1209_v11 = vpack.i.bf16 %v355_v9, %v348_v10 }
  0x8e   : > { %418 = vrot.lane.b32.xlu1 %v353_v5, %s1285_s20  ;;  %406 = vrot.lane.b32.xlu0 %v353_v5, %s1286_s21 }
  0x92   : > { %1210 = vrot.lane.b32.xlu0 %v1209_v11, %s1284_s19  ;;  %1200 = vrot.lane.b32.xlu1 %v1209_v11, %s1281_s17 }
  0x96   : > { %1220 = vrot.lane.b32.xlu0 %v1209_v11, %s1286_s21  ;;  %1205 = vrot.lane.b32.xlu1 %v1209_v11, %s1280_s16 }
  0x9a   : > { %1230 = vrot.lane.b32.xlu0 %v1209_v11, %s1288_s22  ;;  %1215 = vrot.lane.b32.xlu1 %v1209_v11, %s1283_s18 }
  0x9e   : > { %430 = vrot.lane.b32.xlu0 %v353_v5, %s1288_s22  ;;  %1225 = vrot.lane.b32.xlu1 %v1209_v11, %s1285_s20 }
  0xa2   : > { %446 = vrot.lane.b32.xlu0 %v355_v9, %s1291_s23  ;;  %444 = vrot.lane.b32.xlu1 %v348_v10, %s1291_s23 }
  0xa6   : > { %442 = vrot.lane.b32.xlu1 %v353_v5, %s1291_s23  ;;  %603 = vperm.xlu0 %1234, %v600_v14  }
  0xaa   : > { %612 = vperm.xlu1 %1235, %v609_v15  }
  0xf8   : > { %v371_v16 = vpop.permute.xlu1 %370  ;;  %v359_v17 = vpop.permute.xlu0 %358 }
  0xfc   : > { %v395_v18 = vpop.permute.xlu1 %394  ;;  %v383_v19 = vpop.permute.xlu0 %382 }
 0x100   : > { %v1410_v20 = vpop.permute.xlu1 %418  ;;  %v407_v21 = vpop.permute.xlu0 %406 }
 0x104   : > { %v1211_v22 = vpop.permute.xlu0 %1210  ;;  %v1201_v23 = vpop.permute.xlu1 %1200 }
 0x105   : > { %v1203_v24 = vunpack.i.h.bf16 %v1201_v23  ;;  %v1202_v25 = vunpack.i.l.bf16 %v1201_v23  ;;  %v1213_v26 = vunpack.i.h.bf16 %v1211_v22  ;;  %v1212_v27 = vunpack.i.l.bf16 %v1211_v22 }
 0x107   : > { %v1132_v29 = vpack.c.bf16 %v1203_v24, %v349_v8  ;;  %v366_v30 = vsel %vm364_vm3, %v1202_v25, %v1203_v24  ;;  %v365_v31 = vsel %vm364_vm3, %v359_v17, %v1202_v25  ;;  %v390_v41 = vsel %vm388_vm7, %v1212_v27, %v1213_v26  ;;  %v454_v17 = vld [vmem:[%s1542_s1] sm:$0xff] }
 0x108   : > { %v1221_v32 = vpop.permute.xlu0 %1220  ;;  %v1206_v33 = vpop.permute.xlu1 %1205  ;;  %v1114_v34 = vpack.c.bf16 %v366_v30, %v348_v10  ;;  %v1116_v35 = vpack.c.bf16 %v365_v31, %v1373_v4  ;;  %v389_v45 = vsel %vm388_vm7, %v383_v19, %v1212_v27 }
 0x109   : > { %v1208_v37 = vunpack.i.h.bf16 %v1206_v33  ;;  %v1207_v38 = vunpack.i.l.bf16 %v1206_v33  ;;  %1134 = vmatpush3.bf16.msk.msra.mxu1 %vm1414_vm6, %v1132_v29  ;;  %v1223_v39 = vunpack.i.h.bf16 %v1221_v32  ;;  %v1222_v40 = vunpack.i.l.bf16 %v1221_v32 }
 0x10a   : > { %1115 = vmatprep.subr.bf16.mxu0 %v1114_v34  ;;  %1135 = vmatprep.subr.bf16.mxu1 %v1282_v7 }
 0x10b   : > { %v1136_v42 = vpack.c.bf16 %v1213_v26, %v1208_v37  ;;  %1118 = vmatpush1.bf16.msk.msra.mxu0 %vm1421_vm8, %v1116_v35  ;;  %v378_v43 = vsel %vm376_vm9, %v1207_v38, %v1208_v37  ;;  %v377_v44 = vsel %vm376_vm9, %v371_v16, %v1207_v38  ;;  %v414_v54 = vsel %vm1555_vm10, %v1222_v40, %v1223_v39 }
 0x10c   : > { %v1231_v46 = vpop.permute.xlu0 %1230  ;;  %v1216_v47 = vpop.permute.xlu1 %1215  ;;  %v1119_v48 = vpack.c.bf16 %v390_v41, %v378_v43  ;;  %v1121_v49 = vpack.c.bf16 %v389_v45, %v377_v44  ;;  %v413_v58 = vsel %vm1555_vm10, %v407_v21, %v1222_v40  ;;  %v664_v41 = vlaneseq  ;;  %v337_v44 = vld [vmem:[%s1549_s8] sm:$0x7] }
 0x10d   : > { %v1218_v50 = vunpack.i.h.bf16 %v1216_v47  ;;  %v1217_v51 = vunpack.i.l.bf16 %v1216_v47  ;;  %1137 = vmatpush3.bf16.msra.mxu1 %v1136_v42  ;;  %v1233_v52 = vunpack.i.h.bf16 %v1231_v46  ;;  %v1232_v53 = vunpack.i.l.bf16 %v1231_v46  ;;  %v336_v42 = vld [vmem:[%s1548_s7] sm:$0x7] }
 0x10e   : > { %1120 = vmatprep.subr.bf16.mxu0 %v1119_v48  ;;  %1138 = vmatprep.subr.bf16.mxu1 %v1282_v7  ;;  %v665_v43 = vshrl.u32 %v664_v41, 7  ;;  %vm662_vm5 = vcmp.gt.f32.partialorder %v336_v42, 0.5 }
 0x10f   : > { %v1139_v55 = vpack.c.bf16 %v1223_v39, %v1218_v50  ;;  %1122 = vmatpush1.bf16.msra.mxu0 %v1121_v49  ;;  %v402_v56 = vsel %vm400_vm11, %v1217_v51, %v1218_v50  ;;  %v401_v57 = vsel %vm400_vm11, %v395_v18, %v1217_v51  ;;  %v438_v4 = vsel %vm1553_vm12, %v1232_v53, %v1233_v52 }
 0x110   : > { %v431_v59 = vpop.permute.xlu0 %430  ;;  %v1226_v60 = vpop.permute.xlu1 %1225  ;;  %v1123_v61 = vpack.c.bf16 %v414_v54, %v402_v56  ;;  %v1125_v62 = vpack.c.bf16 %v413_v58, %v401_v57  ;;  %v670_v45 = vsub.s32 1, %v665_v43  ;;  %v663_v46 = vsel %vm662_vm5, 1, %v1290_v13 }
 0x111   : > { %v1228_v63 = vunpack.i.h.bf16 %v1226_v60  ;;  %v1227_v3 = vunpack.i.l.bf16 %v1226_v60  ;;  %1140 = vmatpush3.bf16.msra.mxu1 %v1139_v55  ;;  %v437_v5 = vsel %vm1553_vm12, %v431_v59, %v1232_v53  ;;  %v674_v47 = vsub.s32 2, %v665_v43 }
 0x112   : > { %1124 = vmatprep.subr.bf16.mxu0 %v1123_v61  ;;  %1141 = vmatprep.subr.bf16.mxu1 %v1282_v7  ;;  %v666_v49 = vsub.s32 0, %v665_v43  ;;  %v671_v51 = vrot.slane %v663_v46, %v670_v45  ;;  %vm655_vm12 = vcmask 15360  }
 0x113   : > { %v1142_v6 = vpack.c.bf16 %v1233_v52, %v1228_v63  ;;  %1126 = vmatpush1.bf16.msra.mxu0 %v1125_v62  ;;  %v426_v8 = vsel %vm1554_vm13, %v1227_v3, %v1228_v63  ;;  %v425_v9 = vsel %vm1554_vm13, %v1410_v20, %v1227_v3  ;;  %v675_v54 = vrot.slane %v663_v46, %v674_v47 }
 0x114   : > { %v447_v10 = vpop.permute.xlu0 %446  ;;  %v445_v11 = vpop.permute.xlu1 %444  ;;  %v1127_v14 = vpack.c.bf16 %v438_v4, %v426_v8  ;;  %v1129_v15 = vpack.c.bf16 %v437_v5, %v425_v9  ;;  %v667_v56 = vrot.slane %v663_v46, %v666_v49 }
 0x115   : > { %1143 = vmatpush3.bf16.msra.mxu1 %v1142_v6  ;;  %v450_v16 = vsel %vm1552_vm14, %v445_v11, %v447_v10 }
 0x116   : > { %1128 = vmatprep.subr.bf16.mxu0 %v1127_v14  ;;  %1088 = vmatprep.subr.mxu1 %v1287_v12  ;;  %vm676_vm13 = vcmp.eq.s32.totalorder %v667_v56, 1 }
 0x117   : > { %1130 = vmatpush1.bf16.msra.mxu0 %v1129_v15 }
 0x118   : > { %v443_v18 = vpop.permute.xlu1 %442  ;;  %475 = vmatprep.subr.mxu0 %v450_v16 }
 0x119   : > { %1089 = vmatpush3.msra.mxu1 %v447_v10  ;;  %v449_v19 = vsel %vm1552_vm14, %v443_v18, %v445_v11  ;;  %vm678_vm14 = vcmp.eq.s32.totalorder %v675_v54, 1 }
 0x11a   : > { %1091 = vmatmul.mubr.msk.f32.vlgmr.msra.gmra.mrb[0].mxu1 %vm1551_vm15, %v454_v17  ;;  %1161 = vmatprep.subr.bf16.mxu1 %v1282_v7 }
 0x11b   : > { %476 = vmatpush1.msra.mxu0 %v449_v19  ;;  %1111 = vmatprep.mubr.msk.f32.mxu1 %vm1289_vm2, %v1287_v12  ;;  %vm631_vm2 = vcmask 408576  }
 0x11c   : > { %1042 = vmatmul.mubr.msk.f32.vlgmr.msra.gmra.mrb[0].mxu0 %vm1551_vm15, %v454_v17  ;;  %vm677_vm15 = vcmp.eq.s32.totalorder %v671_v51, 1 }
 0x11d   : > { %876 = vmatprep.mubr.f32.mxu0 %v1287_v12 }
 0x125   : > { %v604_v20 = vpop.permute.xlu0 %603 }
 0x129   : > { %v613_v22 = vpop.permute.xlu1 %612 }
 0x1ed   : > { %v596_v21 = vpop.f32.mrb[0].mxu1 }
 0x1ee   : > { %v608_v23 = vmul.f32 %v604_v20, %v596_v21  ;;  %v1092_v24 = vpop.f32.mrb[1].mxu1 }
 0x1ef   : > { %v525_v25 = vpop.f32.mrb[0].mxu0  ;;  %v962_v24 = vld [vmem:[%s1547_s6] sm:$0xff] }
 0x1f0   : > { %v617_v26 = vadd.f32 %v613_v22, %v608_v23  ;;  %v606_v27 = vmul.f32 %v604_v20, %v525_v25  ;;  %v527_v29 = vpop.f32.mrb[1].mxu0  ;;  %v953_v23 = vld [vmem:[%s1546_s5] sm:$0xff] }
 0x1f1   : > { %v607_v30 = vmul.f32 %v604_v20, %v527_v29 }
 0x1f2   : > { %v615_v31 = vadd.f32 %v613_v22, %v606_v27  ;;  %v620_v32 = vmax.f32 %v617_v26, 0.0 }
 0x1f3   : > { %v616_v33 = vadd.f32 %v613_v22, %v607_v30 }
 0x1f4   : > { %v618_v34 = vmax.f32 %v615_v31, 0.0  ;;  %626 = vrot.lane.b32.xlu1 %v620_v32, %s1293_s12 }
 0x1f5   : > { %v619_v35 = vmax.f32 %v616_v33, 0.0 }
 0x1f6   : > { %622 = vrot.lane.b32.xlu0 %v618_v34, %s1285_s20 }
 0x1f8   : > { %638 = vrot.lane.b32.xlu1 %v619_v35, %s1280_s16 }
 0x266   : > { %v627_v37 = vpop.permute.xlu1 %626 }
 0x267   : > { %v632_v38 = vsel %vm631_vm2, %v620_v32, %v627_v37  ;;  %vm682_vm2 = vcmp.gt.f32.partialorder %v337_v44, 0.5 }
 0x268   : > { %640 = vrot.lane.b32.xlu0 %v632_v38, %s1280_s16  ;;  %v623_v39 = vpop.permute.xlu0 %622  ;;  %v683_v52 = vsel %vm682_vm2, 1, %v1290_v13 }
 0x269   : > { %v630_v40 = vsel %vm629_vm4, %v623_v39, %v618_v34  ;;  %v691_v53 = vrot.slane %v683_v52, %v670_v45  ;;  %vm647_vm4 = vcmask 539648   ;;  %v695_v57 = vrot.slane %v683_v52, %v674_v47 }
 0x26a   : > { %636 = vrot.lane.b32.xlu1 %v630_v40, %s1280_s16  ;;  %v639_v48 = vpop.permute.xlu1 %638  ;;  %v687_v60 = vrot.slane %v683_v52, %v666_v49 }
 0x26b   : > { %vm697_vm5 = vcmp.eq.s32.totalorder %v691_v53, 1  ;;  %vm698_vm2 = vcmp.eq.s32.totalorder %v695_v57, 1 }
 0x26c   : > { %649 = vrot.lane.b32.xlu0 %v630_v40, %s1294_s13  ;;  %vm696_vm10 = vcmp.eq.s32.totalorder %v687_v60, 1 }
 0x26e   : > { %651 = vrot.lane.b32.xlu1 %v619_v35, %s1294_s13 }
 0x270   : > { %653 = vrot.lane.b32.xlu0 %v632_v38, %s1294_s13 }
 0x2da   : > { %v641_v50 = vpop.permute.xlu0 %640 }
 0x2db   : > { %v643_v58 = vsel %vm376_vm9, %v639_v48, %v641_v50  ;;  %v648_v61 = vsel %vm647_vm4, %v641_v50, 0.0 }
 0x2dc   : > { %v637_v55 = vpop.permute.xlu1 %636  ;;  %v680_v3 = vsel %vm677_vm15, %v643_v58, %v619_v35  ;;  %v681_v9 = vsel %vm678_vm14, %v648_v61, %v632_v38 }
 0x2dd   : > { %v642_v62 = vsel %vm376_vm9, %v637_v55, %v639_v48 }
 0x2de   : > { %v650_v59 = vpop.permute.xlu0 %649  ;;  %v679_v10 = vsel %vm676_vm13, %v642_v62, %v630_v40  ;;  %vm976_vm13 = vcmask 556032  }
 0x2df   : > { %v661_v6 = vsel %vm655_vm12, 0.0, %v650_v59 }
 0x2e0   : > { %v652_v63 = vpop.permute.xlu1 %651  ;;  %v699_v14 = vsel %vm696_vm10, %v661_v6, %v679_v10  ;;  %vm1567_vm10 = vcmask 588800  }
 0x2e1   : > { %v656_v13 = vsel %vm655_vm12, %v650_v59, %v652_v63 }
 0x2e2   : > { %v654_v4 = vpop.permute.xlu0 %653  ;;  %v700_v5 = vsel %vm697_vm5, %v656_v13, %v680_v3 }
 0x2e3   : > { %v657_v8 = vsel %vm655_vm12, %v652_v63, %v654_v4  ;;  %707 = vrot.lane.b32.xlu1 %v700_v5, %s1279_s15  ;;  %vm1569_vm12 = vmmov %vm1567_vm10 }
 0x2e4   : > { %v701_v11 = vsel %vm698_vm2, %v657_v8, %v681_v9 }
 0x2e5   : > { %709 = vrot.lane.b32.xlu0 %v701_v11, %s1279_s15 }
 0x2e7   : > { %705 = vrot.lane.b32.xlu1 %v699_v14, %s1279_s15 }
 0x355   : > { %v708_v15 = vpop.permute.xlu1 %707 }
 0x357   : > { %v710_v16 = vpop.permute.xlu0 %709 }
 0x358   : > { %v712_v17 = vsel %vm347_vm0, %v708_v15, %v710_v16 }
 0x359   : > { %v717_v18 = vsel %vm354_vm1, %v712_v17, 0.0  ;;  %v706_v19 = vpop.permute.xlu1 %705 }
 0x35a   : > { %v711_v20 = vsel %vm347_vm0, %v706_v19, %v708_v15  ;;  %v716_v21 = vsel %vm347_vm0, 0.0, %v706_v19  ;;  %vm1560_vm0 = vcmask 883712  }
 0x35b   : > { %720 = vrot.lane.b32.xlu1 %v716_v21, %s1281_s17  ;;  %v1236_v22 = vpack.i.bf16 %v717_v18, %v711_v20  ;;  %vm1561_vm1 = vmmov %vm1560_vm0 }
 0x35d   : > { %1237 = vrot.lane.b32.xlu0 %v1236_v22, %s1281_s17 }
 0x35f   : > { %1247 = vrot.lane.b32.xlu1 %v1236_v22, %s1284_s19 }
 0x361   : > { %1242 = vrot.lane.b32.xlu0 %v1236_v22, %s1280_s16 }
 0x363   : > { %742 = vrot.lane.b32.xlu1 %v716_v21, %s1284_s19 }
 0x365   : > { %731 = vrot.lane.b32.xlu0 %v716_v21, %s1280_s16 }
 0x367   : > { %1257 = vrot.lane.b32.xlu1 %v1236_v22, %s1286_s21 }
 0x369   : > { %1252 = vrot.lane.b32.xlu0 %v1236_v22, %s1283_s18 }
 0x36b   : > { %764 = vrot.lane.b32.xlu1 %v716_v21, %s1286_s21 }
 0x36d   : > { %753 = vrot.lane.b32.xlu0 %v716_v21, %s1283_s18 }
 0x36f   : > { %1267 = vrot.lane.b32.xlu1 %v1236_v22, %s1288_s22 }
 0x371   : > { %1262 = vrot.lane.b32.xlu0 %v1236_v22, %s1285_s20 }
 0x373   : > { %786 = vrot.lane.b32.xlu1 %v716_v21, %s1288_s22 }
 0x375   : > { %775 = vrot.lane.b32.xlu0 %v716_v21, %s1285_s20 }
 0x377   : > { %801 = vrot.lane.b32.xlu1 %v717_v18, %s1291_s23 }
 0x379   : > { %799 = vrot.lane.b32.xlu0 %v711_v20, %s1291_s23 }
 0x37b   : > { %956 = vperm.xlu1 %1235, %v953_v23  }
 0x37d   : > { %797 = vrot.lane.b32.xlu0 %v716_v21, %s1291_s23  ;;  %s332_s23 = scalar_lea.vmem %s1550_s9, %s1174_s11 }
 0x381   : > { %965 = vperm.xlu0 %1234, %v962_v24  }
 0x3cd   : > { %v721_v25 = vpop.permute.xlu1 %720 }
 0x3cf   : > { %v1238_v26 = vpop.permute.xlu0 %1237 }
 0x3d0   : > { %v1240_v27 = vunpack.i.h.bf16 %v1238_v26  ;;  %v1239_v29 = vunpack.i.l.bf16 %v1238_v26 }
 0x3d1   : > { %v1248_v30 = vpop.permute.xlu1 %1247 }
 0x3d2   : > { %v1162_v31 = vpack.c.bf16 %v1240_v27, %v712_v17  ;;  %v726_v32 = vsel %vm364_vm3, %v721_v25, %v1239_v29  ;;  %v1250_v33 = vunpack.i.h.bf16 %v1248_v30  ;;  %v1249_v34 = vunpack.i.l.bf16 %v1248_v30 }
 0x3d3   : > { %v1146_v35 = vpack.c.bf16 %v726_v32, %v706_v19  ;;  %v1243_v37 = vpop.permute.xlu0 %1242  ;;  %v727_v38 = vsel %vm364_vm3, %v1239_v29, %v1240_v27  ;;  %vm1562_vm3 = vcmask 752640   ;;  %v808_v19 = vld [vmem:[%s1545_s4] sm:$0xff] }
 0x3d4   : > { %v1245_v39 = vunpack.i.h.bf16 %v1243_v37  ;;  %v1244_v40 = vunpack.i.l.bf16 %v1243_v37  ;;  %1164 = vmatpush3.bf16.msk.msra.mxu1 %vm1414_vm6, %v1162_v31  ;;  %v1144_v41 = vpack.c.bf16 %v727_v38, %v711_v20  ;;  %v749_v45 = vsel %vm388_vm7, %v1249_v34, %v1250_v33 }
 0x3d5   : > { %v743_v42 = vpop.permute.xlu1 %742  ;;  %1165 = vmatprep.subr.bf16.mxu1 %v1282_v7  ;;  %vm1563_vm6 = vcmask 744448  }
 0x3d6   : > { %v1166_v43 = vpack.c.bf16 %v1250_v33, %v1245_v39  ;;  %1145 = vmatprep.subr.bf16.mxu0 %v1144_v41  ;;  %v738_v44 = vsel %vm376_vm9, %v1244_v40, %v1245_v39  ;;  %v748_v48 = vsel %vm388_vm7, %v743_v42, %v1249_v34  ;;  %vm1564_vm7 = vmmov %vm1563_vm6 }
 0x3d7   : > { %1148 = vmatpush1.bf16.msk.msra.mxu0 %vm1421_vm8, %v1146_v35  ;;  %v732_v46 = vpop.permute.xlu0 %731  ;;  %v1149_v47 = vpack.c.bf16 %v749_v45, %v738_v44  ;;  %vm1565_vm8 = vmmov %vm1562_vm3 }
 0x3d8   : > { %v737_v28 = vsel %vm376_vm9, %v732_v46, %v1244_v40  ;;  %1167 = vmatpush3.bf16.msra.mxu1 %v1166_v43  ;;  %vm1566_vm9 = vcmask 736256  }
 0x3d9   : > { %v1151_v49 = vpack.c.bf16 %v748_v48, %v737_v28  ;;  %v1258_v50 = vpop.permute.xlu1 %1257  ;;  %1150 = vmatprep.subr.bf16.mxu0 %v1149_v47  ;;  %1168 = vmatprep.subr.bf16.mxu1 %v1282_v7 }
 0x3da   : > { %v1260_v51 = vunpack.i.h.bf16 %v1258_v50  ;;  %v1259_v52 = vunpack.i.l.bf16 %v1258_v50 }
 0x3db   : > { %v1253_v53 = vpop.permute.xlu0 %1252  ;;  %1152 = vmatpush1.bf16.msra.mxu0 %v1151_v49 }
 0x3dc   : > { %v1255_v54 = vunpack.i.h.bf16 %v1253_v53  ;;  %v1254_v55 = vunpack.i.l.bf16 %v1253_v53  ;;  %v771_v58 = vsel %vm1560_vm0, %v1259_v52, %v1260_v51 }
 0x3dd   : > { %v765_v36 = vpop.permute.xlu1 %764 }
 0x3de   : > { %v1169_v56 = vpack.c.bf16 %v1260_v51, %v1255_v54  ;;  %v760_v57 = vsel %vm400_vm11, %v1254_v55, %v1255_v54  ;;  %v770_v61 = vsel %vm1561_vm1, %v765_v36, %v1259_v52 }
 0x3df   : > { %v754_v59 = vpop.permute.xlu0 %753  ;;  %v1153_v60 = vpack.c.bf16 %v771_v58, %v760_v57 }
 0x3e0   : > { %v759_v62 = vsel %vm400_vm11, %v754_v59, %v1254_v55  ;;  %1170 = vmatpush3.bf16.msra.mxu1 %v1169_v56  ;;  %vm1568_vm11 = vmmov %vm1566_vm9 }
 0x3e1   : > { %v1155_v63 = vpack.c.bf16 %v770_v61, %v759_v62  ;;  %v1268_v13 = vpop.permute.xlu1 %1267  ;;  %1154 = vmatprep.subr.bf16.mxu0 %v1153_v60  ;;  %1171 = vmatprep.subr.bf16.mxu1 %v1282_v7 }
 0x3e2   : > { %v1270_v3 = vunpack.i.h.bf16 %v1268_v13  ;;  %v1269_v4 = vunpack.i.l.bf16 %v1268_v13 }
 0x3e3   : > { %v1263_v5 = vpop.permute.xlu0 %1262  ;;  %1156 = vmatpush1.bf16.msra.mxu0 %v1155_v63 }
 0x3e4   : > { %v1265_v6 = vunpack.i.h.bf16 %v1263_v5  ;;  %v1264_v8 = vunpack.i.l.bf16 %v1263_v5  ;;  %v793_v14 = vsel %vm1563_vm6, %v1269_v4, %v1270_v3 }
 0x3e5   : > { %v787_v9 = vpop.permute.xlu1 %786 }
 0x3e6   : > { %v1172_v10 = vpack.c.bf16 %v1270_v3, %v1265_v6  ;;  %v782_v11 = vsel %vm1562_vm3, %v1264_v8, %v1265_v6  ;;  %v792_v17 = vsel %vm1564_vm7, %v787_v9, %v1269_v4 }
 0x3e7   : > { %v776_v15 = vpop.permute.xlu0 %775  ;;  %v1157_v16 = vpack.c.bf16 %v793_v14, %v782_v11 }
 0x3e8   : > { %v781_v18 = vsel %vm1565_vm8, %v776_v15, %v1264_v8  ;;  %1173 = vmatpush3.bf16.msra.mxu1 %v1172_v10 }
 0x3e9   : > { %v1159_v7 = vpack.c.bf16 %v792_v17, %v781_v18  ;;  %1158 = vmatprep.subr.bf16.mxu0 %v1157_v16  ;;  %1109 = vmatprep.subr.mxu1 %v1287_v12  ;;  %v802_v20 = vpop.permute.xlu1 %801 }
 0x3eb   : > { %v800_v21 = vpop.permute.xlu0 %799  ;;  %1160 = vmatpush1.bf16.msra.mxu0 %v1159_v7 }
 0x3ec   : > { %1110 = vmatpush3.msra.mxu1 %v802_v20  ;;  %v804_v22 = vsel %vm1566_vm9, %v800_v21, %v802_v20 }
 0x3ed   : > { %828 = vmatprep.subr.mxu0 %v804_v22  ;;  %1112 = vmatmul.mubr.msk.f32.vlgmr.msra.gmra.mrb[2].mxu1 %vm1567_vm10, %v808_v19 }
 0x3ef   : > { %v798_v23 = vpop.permute.xlu0 %797 }
 0x3f0   : > { %v803_v24 = vsel %vm1568_vm11, %v798_v23, %v800_v21 }
 0x3f1   : > { %829 = vmatpush1.msra.mxu0 %v803_v24 }
 0x3f2   : > { %1047 = vmatmul.mubr.msk.f32.vlgmr.msra.gmra.mrb[2].mxu0 %vm1569_vm12, %v808_v19 }
 0x3fa   : > { %v957_v12 = vpop.permute.xlu1 %956 }
 0x400   : > { %v966_v29 = vpop.permute.xlu0 %965 }
 0x4c0   : > { %v949_v25 = vpop.f32.mrb[2].mxu1 }
 0x4c1   : > { %v961_v26 = vmul.f32 %v957_v12, %v949_v25  ;;  %v1113_v27 = vpop.f32.mrb[3].mxu1 }
 0x4c3   : > { %v970_v30 = vadd.f32 %v966_v29, %v961_v26 }
 0x4c5   : > { %v973_v31 = vadd.f32 %v970_v30, %v1369_v2  ;;  %v878_v32 = vpop.f32.mrb[2].mxu0 }
 0x4c6   : > { %v959_v33 = vmul.f32 %v957_v12, %v878_v32  ;;  %v880_v34 = vpop.f32.mrb[3].mxu0 }
 0x4c7   : > { %977 = vst.msk [vmem:[%s332_s23 + $0x10] sm:$0xff] %vm976_vm13, %v973_v31  ;;  %v960_v35 = vmul.f32 %v957_v12, %v880_v34 }
 0x4c8   : > { %v968_v37 = vadd.f32 %v966_v29, %v959_v33 }
 0x4c9   : > { %v969_v38 = vadd.f32 %v966_v29, %v960_v35 }
 0x4ca   : > { %v971_v39 = vadd.f32 %v968_v37, %v1363_v1 }
 0x4cb   : > { %v972_v40 = vadd.f32 %v969_v38, %v1361_v0 }
 0x4cc   : > { %974 = vst [vmem:[%s332_s23] sm:$0xff] %v971_v39 }
 0x4cd   : > { %975 = vst [vmem:[%s332_s23 + $0x8] sm:$0xff] %v972_v40 }
 0x4ce PF: > { %s19_s30 = sadd.s32 1, %s1277_s30  }
 0x4cf   : > { %p16_p4 = scmp.ge.s32.totalorder %s19_s30, 4  }
 0x4d1   :  { %18 = sbr.rel (!%p16_p4) target bundleno = 1 (0x1), region = 86 }

</bundles_post_ra>
